<compile_context>
chip_gen: v5e
topology: v5e:2x2
jax: 0.10.0
libtpu: 0.0.40
codegen_flags: <defaults>
</compile_context>

<pallas_src>
import jax
import jax.numpy as jnp
from jax.experimental import pallas as pl
from jax.experimental.pallas import tpu as pltpu


def mlp_kernel(x_ref, w1_ref, b1_ref, w2_ref, b2_ref, o_ref):
    x = x_ref[...]                                                    # (TB, n_input)
    # linear1 on the MXU with f32 accumulation.
    h = jnp.dot(x, w1_ref[...], preferred_element_type=jnp.float32)  # (TB, n_hidden)
    h = jnp.maximum(h + b1_ref[...], 0.0)                            # bias + ReLU (VPU)
    # linear2 (n_hidden -> 1): VPU broadcast-multiply + XLU lane reduce against
    # a lane-dense (1, n_hidden) w2 instead of a 1-column MXU matmul.
    z = jnp.sum(h * w2_ref[...], axis=-1, keepdims=True)             # (TB, 1)
    z = z + b2_ref[0]                                                # scalar bias from SMEM
    o_ref[...] = jax.nn.sigmoid(z)                                   # logistic -> EUP


def two_class_network_forward(x, w1, b1, w2, b2, *, tb=128):
    """x: (B, n_input) f32; w1: (n_input, n_hidden); b1: (1, n_hidden);
       w2: (1, n_hidden)  (torch linear2.weight layout); b2: (1,).
       Returns (B, 1) f32 sigmoid output."""
    B, n_input = x.shape
    n_hidden = w1.shape[1]

    if B <= tb:
        tb = B                      # single tile; block == full array is always legal
    else:
        assert B % tb == 0 and tb % 8 == 0, \
            "batch tile must be a multiple of 8 that divides B"
    grid = (B // tb,)

    return pl.pallas_call(
        mlp_kernel,
        out_shape=jax.ShapeDtypeStruct((B, 1), jnp.float32),
        grid=grid,
        in_specs=[
            pl.BlockSpec((tb, n_input), lambda i: (i, 0)),           # x: tiled over batch
            pl.BlockSpec((n_input, n_hidden), lambda i: (0, 0)),     # w1: resident
            pl.BlockSpec((1, n_hidden), lambda i: (0, 0)),           # b1: resident
            pl.BlockSpec((1, n_hidden), lambda i: (0, 0)),           # w2: resident, lane-dense
            pl.BlockSpec(memory_space=pltpu.MemorySpace.SMEM),       # b2: scalar in SMEM
        ],
        out_specs=pl.BlockSpec((tb, 1), lambda i: (i, 0)),
        compiler_params=pltpu.CompilerParams(
            dimension_semantics=("parallel",)),
    )(x, w1, b1, w2, b2)


def init_params(key, n_input, n_hidden):
    """PyTorch nn.Linear default init: U(-1/sqrt(fan_in), 1/sqrt(fan_in))."""
    k1, k2, k3, k4 = jax.random.split(key, 4)
    bound1 = 1.0 / float(n_input) ** 0.5
    bound2 = 1.0 / float(n_hidden) ** 0.5
    # w1 stored transposed vs torch ((in, out)) so the kernel does x @ w1.
    w1 = jax.random.uniform(k1, (n_input, n_hidden), jnp.float32, -bound1, bound1)
    b1 = jax.random.uniform(k2, (1, n_hidden), jnp.float32, -bound1, bound1)
    # w2 kept in torch's (out, in) = (1, n_hidden) layout (lane-dense).
    w2 = jax.random.uniform(k3, (1, n_hidden), jnp.float32, -bound2, bound2)
    b2 = jax.random.uniform(k4, (1,), jnp.float32, -bound2, bound2)
    return w1, b1, w2, b2


if __name__ == "__main__":
    key = jax.random.PRNGKey(0)
    k_x, k_p = jax.random.split(key)

    batch, n_input, n_hidden = 256, 16, 32     # 2 batch tiles of 128 rows
    x = jax.random.normal(k_x, (batch, n_input), jnp.float32)
    w1, b1, w2, b2 = init_params(k_p, n_input, n_hidden)

    out = jax.block_until_ready(two_class_network_forward(x, w1, b1, w2, b2, tb=128))

    # Pure-JAX reference of the fused forward pass.
    ref = jax.nn.sigmoid(jnp.maximum(x @ w1 + b1, 0.0) @ w2.T + b2)
    assert out.shape == (batch, 1)
    # Tolerance accounts for MXU default-precision f32 matmul vs the XLA path.
    assert jnp.allclose(out, ref, atol=2e-3, rtol=2e-3), float(jnp.max(jnp.abs(out - ref)))

    print("KERNEL_OK")
</pallas_src>

<mosaic_0001>
module attributes {stable_mosaic.version = 11 : i64} {
  func.func @mlp_kernel(%arg0: i32, %arg1: memref<128x16xf32, #tpu.memory_space<vmem>>, %arg2: memref<16x32xf32, #tpu.memory_space<vmem>>, %arg3: memref<1x32xf32, #tpu.memory_space<vmem>>, %arg4: memref<1x32xf32, #tpu.memory_space<vmem>>, %arg5: memref<1xf32, #tpu.memory_space<smem>>, %arg6: memref<128x1xf32, #tpu.memory_space<vmem>>) attributes {dimension_semantics = [#tpu.dimension_semantics<parallel>], iteration_bounds = array<i64: 2>, scalar_prefetch = 0 : i64, scratch_operands = 0 : i64, tpu.core_type = #tpu.core_type<tc>, window_params = [{transform_indices = @transform_0, window_bounds = array<i64: 128, 16>}, {pipeline_mode = #tpu.pipeline_mode<synchronous>, transform_indices = @transform_1, window_bounds = array<i64: 16, 32>}, {pipeline_mode = #tpu.pipeline_mode<synchronous>, transform_indices = @transform_2, window_bounds = array<i64: 1, 32>}, {pipeline_mode = #tpu.pipeline_mode<synchronous>, transform_indices = @transform_3, window_bounds = array<i64: 1, 32>}, {transform_indices = @transform_4, window_bounds = array<i64: 1>}, {transform_indices = @transform_5, window_bounds = array<i64: 128, 1>}]} {
    %c0 = arith.constant 0 : index
    %c0_0 = arith.constant 0 : index
    %0 = vector.load %arg1[%c0, %c0_0] : memref<128x16xf32, #tpu.memory_space<vmem>>, vector<128x16xf32>
    %c0_1 = arith.constant 0 : index
    %c0_2 = arith.constant 0 : index
    %1 = vector.load %arg2[%c0_1, %c0_2] : memref<16x32xf32, #tpu.memory_space<vmem>>, vector<16x32xf32>
    %cst = arith.constant dense<0.000000e+00> : vector<128x32xf32>
    %2 = tpu.matmul %0, %1, %cst {dimension_numbers = #tpu.dot_dimension_numbers<[1], [0], [0], [1], [0, 0, 1, 1], [], []>} : vector<128x16xf32>, vector<16x32xf32>, vector<128x32xf32> -> vector<128x32xf32>
    %c0_3 = arith.constant 0 : index
    %c0_4 = arith.constant 0 : index
    %3 = vector.load %arg3[%c0_3, %c0_4] : memref<1x32xf32, #tpu.memory_space<vmem>>, vector<1x32xf32>
    %4 = vector.broadcast %3 : vector<1x32xf32> to vector<128x32xf32>
    %5 = arith.addf %2, %4 : vector<128x32xf32>
    %cst_5 = arith.constant 0.000000e+00 : f32
    %6 = vector.broadcast %cst_5 : f32 to vector<128x32xf32>
    %7 = arith.maximumf %5, %6 : vector<128x32xf32>
    %c0_6 = arith.constant 0 : index
    %c0_7 = arith.constant 0 : index
    %8 = vector.load %arg4[%c0_6, %c0_7] : memref<1x32xf32, #tpu.memory_space<vmem>>, vector<1x32xf32>
    %9 = vector.broadcast %8 : vector<1x32xf32> to vector<128x32xf32>
    %10 = arith.mulf %7, %9 : vector<128x32xf32>
    %cst_8 = arith.constant dense<0.000000e+00> : vector<128xf32>
    %11 = vector.multi_reduction <add>, %10, %cst_8 [1] : vector<128x32xf32> to vector<128xf32>
    %12 = vector.shape_cast %11 : vector<128xf32> to vector<128x1xf32>
    %c0_9 = arith.constant 0 : index
    %13 = memref.load %arg5[%c0_9] : memref<1xf32, #tpu.memory_space<smem>>
    %14 = vector.broadcast %13 : f32 to vector<128x1xf32>
    %15 = arith.addf %12, %14 : vector<128x1xf32>
    %16 = arith.negf %15 : vector<128x1xf32>
    %17 = math.exp %16 : vector<128x1xf32>
    %cst_10 = arith.constant 1.000000e+00 : f32
    %18 = vector.broadcast %cst_10 : f32 to vector<128x1xf32>
    %19 = arith.addf %18, %17 : vector<128x1xf32>
    %20 = arith.divf %18, %19 : vector<128x1xf32>
    %c0_11 = arith.constant 0 : index
    %c0_12 = arith.constant 0 : index
    %21 = vector.load %arg6[%c0_11, %c0_12] : memref<128x1xf32, #tpu.memory_space<vmem>>, vector<128x1xf32>
    tpu.vector_store %arg6[%c0_11, %c0_12], %20 {strides = array<i32>} : memref<128x1xf32, #tpu.memory_space<vmem>>, vector<128x1xf32>,
    return
  }
  func.func @transform_0(%arg0: i32) -> (i32, i32) {
    %c0_i32 = arith.constant 0 : i32
    %c0_i32_0 = arith.constant 0 : i32
    return %arg0, %c0_i32 : i32, i32
  }
  func.func @transform_1(%arg0: i32) -> (i32, i32) {
    %c0_i32 = arith.constant 0 : i32
    %c0_i32_0 = arith.constant 0 : i32
    %c0_i32_1 = arith.constant 0 : i32
    return %c0_i32, %c0_i32_0 : i32, i32
  }
  func.func @transform_2(%arg0: i32) -> (i32, i32) {
    %c0_i32 = arith.constant 0 : i32
    %c0_i32_0 = arith.constant 0 : i32
    %c0_i32_1 = arith.constant 0 : i32
    return %c0_i32, %c0_i32_0 : i32, i32
  }
  func.func @transform_3(%arg0: i32) -> (i32, i32) {
    %c0_i32 = arith.constant 0 : i32
    %c0_i32_0 = arith.constant 0 : i32
    %c0_i32_1 = arith.constant 0 : i32
    return %c0_i32, %c0_i32_0 : i32, i32
  }
  func.func @transform_4(%arg0: i32) -> i32 {
    %c0_i32 = arith.constant 0 : i32
    %c0_i32_0 = arith.constant 0 : i32
    return %c0_i32 : i32
  }
  func.func @transform_5(%arg0: i32) -> (i32, i32) {
    %c0_i32 = arith.constant 0 : i32
    %c0_i32_0 = arith.constant 0 : i32
    return %arg0, %c0_i32 : i32, i32
  }
}

</mosaic_0001>

<bundles_post_ra>
// kernel: tpu_custom_call.1
= control target key start
LH: loop header
LB: loop body
LE: loop exit
PB: predicated region body
PF: predicated region fallthrough
CT: control target
= control target key end

     0   :  { %s1009_s20 = smov 0   ;;  %s1344_s0 = inlined_call_operand.vmem [shape: f32[256,16], index: 0, kind: input, shape index: {}]   ;;  %s1345_s1 = inlined_call_operand.vmem [shape: f32[16,32], index: 1, kind: input, shape index: {}]   ;;  %s1346_s2 = inlined_call_operand.vmem [shape: f32[1,32], index: 2, kind: input, shape index: {}]   ;;  %s1347_s3 = inlined_call_operand.vmem [shape: f32[1,32], index: 3, kind: input, shape index: {}]   ;;  %s1348_s4 = inlined_call_operand.<no memory space> [shape: f32[1], index: 4, kind: input, shape index: {}]   ;;  %s1349_s5 = inlined_call_operand.vmem [shape: f32[256,1], index: 5, kind: output, shape index: {}]  }
   0x1   :  { %10 = sst [smem:[#allocation2]] %s1348_s4 }
   0x2 LB: > { %s845_s21 = sadd.s32 4294967295, %s974_s20   ;;  %p849_p0 = scmp.ge.s32.totalorder %s974_s20, 1  ;;  %s974_s20 = sphi %s1009_s20, %s16_s20  }
   0x3   : > { %p189_p1 = scmp.lt.s32.totalorder %s974_s20, 3 }
   0x5   : > { %p190_p2 = pnand %p849_p0, %p189_p1 }
   0x6   : > { %s850_s25 = sshll.u32 (!%p190_p2), %s845_s21, 4  ;;  %s450_s9 = sld [smem:[#allocation2]] (!%p190_p2) }
   0x7   : > { %193 = sbr.rel (%p190_p2) target bundleno = 353 (0x161), region = 40  ;;  %p218_p3 = scmp.lt.s32.totalorder (!%p190_p2), %s850_s25, 31 }
   0xc   : > { %v246_v0 = vld [vmem:[%s1345_s1 + $0x8] sm:$0xff]  ;;  %v245_v1 = vld [vmem:[%s1345_s1] sm:$0xff]  ;;  %s1373_s25 = smov (!%p218_p3, %s850_s25), 31  ;;  %vm251_vm0 = vcmask 130048   ;;  %vm401_vm1 = vcmask 261120   ;;  %vm772_vm4 = vcmask 7168  }
   0xd   : > { %314 = vmatpush.msra.mxu0 %v246_v0  ;;  %888 = vmatpush.msra.mxu1 %v246_v0  ;;  %s851_s26 = sshll.u32 %s1373_s25, 3  ;;  %v1050_v18 = vld [vmem:[%s1346_s2] ss:$0 sm:$0xff] }
   0xe   : > { %889 = vmatpush.msra.mxu2 %v246_v0  ;;  %890 = vmatpush.msra.mxu3 %v246_v0  ;;  %s221_s29 = scalar_lea.vmem %s1344_s0, %s851_s26  ;;  %v1057_v23 = vld [vmem:[%s1347_s3] ss:$0 sm:$0xff]  ;;  %s1142_s12 = scalar_lea.vmem %s1349_s5, %s851_s26 }
   0xf   : > { %315 = vmatpush.msra.mxu0 %v245_v1  ;;  %891 = vmatpush.msra.mxu1 %v245_v1  ;;  %v229_v2 = vld [vmem:[%s221_s29] sm:$0xff]  ;;  %v230_v6 = vld [vmem:[%s221_s29 + $0x8] sm:$0xff]  ;;  %v231_v10 = vld [vmem:[%s221_s29 + $0x10] sm:$0xff] }
  0x10   : > { %892 = vmatpush.msra.mxu2 %v245_v1  ;;  %893 = vmatpush.msra.mxu3 %v245_v1  ;;  %v233_v3 = vld [vmem:[%s221_s29 + $0x20] sm:$0xff]  ;;  %v234_v7 = vld [vmem:[%s221_s29 + $0x28] sm:$0xff]  ;;  %v235_v11 = vld [vmem:[%s221_s29 + $0x30] sm:$0xff] }
  0x11   : > { %v237_v4 = vld [vmem:[%s221_s29 + $0x40] sm:$0xff]  ;;  %854 = vmatmul.msk.f32.vlgmr.msra.gmra.mxu0 %vm251_vm0, %v229_v2  ;;  %858 = vmatmul.msk.f32.vlgmr.msra.gmra.mxu1 %vm251_vm0, %v233_v3  ;;  %v238_v8 = vld [vmem:[%s221_s29 + $0x48] sm:$0xff]  ;;  %v239_v12 = vld [vmem:[%s221_s29 + $0x50] sm:$0xff] }
  0x12   : > { %v241_v5 = vld [vmem:[%s221_s29 + $0x60] sm:$0xff]  ;;  %862 = vmatmul.msk.f32.vlgmr.msra.gmra.mxu2 %vm251_vm0, %v237_v4  ;;  %v242_v9 = vld [vmem:[%s221_s29 + $0x68] sm:$0xff]  ;;  %v243_v13 = vld [vmem:[%s221_s29 + $0x70] sm:$0xff] }
  0x13   : > { %866 = vmatmul.msk.f32.vlgmr.msra.gmra.mxu3 %vm251_vm0, %v241_v5  ;;  %v232_v14 = vld [vmem:[%s221_s29 + $0x18] sm:$0xff] }
  0x14   : > { %v236_v15 = vld [vmem:[%s221_s29 + $0x38] sm:$0xff] }
  0x15   : > { %v240_v16 = vld [vmem:[%s221_s29 + $0x58] sm:$0xff] }
  0x16   : > { %v244_v17 = vld [vmem:[%s221_s29 + $0x78] sm:$0xff] }
  0x19   : > { %855 = vmatmul.msk.f32.gmra.mxu0 %vm251_vm0, %v230_v6  ;;  %859 = vmatmul.msk.f32.gmra.mxu1 %vm251_vm0, %v234_v7 }
  0x1a   : > { %863 = vmatmul.msk.f32.gmra.mxu2 %vm251_vm0, %v238_v8 }
  0x1b   : > { %867 = vmatmul.msk.f32.gmra.mxu3 %vm251_vm0, %v242_v9 }
  0x21   : > { %856 = vmatmul.msk.f32.gmra.mxu0 %vm251_vm0, %v231_v10  ;;  %860 = vmatmul.msk.f32.gmra.mxu1 %vm251_vm0, %v235_v11 }
  0x22   : > { %864 = vmatmul.msk.f32.gmra.mxu2 %vm251_vm0, %v239_v12 }
  0x23   : > { %868 = vmatmul.msk.f32.gmra.mxu3 %vm251_vm0, %v243_v13 }
  0x29   : > { %857 = vmatmul.msk.f32.gmra.mxu0 %vm251_vm0, %v232_v14  ;;  %861 = vmatmul.msk.f32.gmra.mxu1 %vm251_vm0, %v236_v15 }
  0x2a   : > { %865 = vmatmul.msk.f32.gmra.mxu2 %vm251_vm0, %v240_v16 }
  0x2b   : > { %869 = vmatmul.msk.f32.gmra.mxu3 %vm251_vm0, %v244_v17 }
  0x8e   : > { %v317_v19 = vpop.f32.mrf.mxu0  ;;  %v329_v20 = vpop.f32.mrf.mxu1 }
  0x8f   : > { %v318_v21 = vadd.f32 %v1050_v18, %v317_v19  ;;  %v330_v22 = vadd.f32 %v1050_v18, %v329_v20 }
  0x91   : > { %v365_v24 = vmax.f32 %v318_v21, 0.0  ;;  %v369_v25 = vmax.f32 %v330_v22, 0.0 }
  0x93   : > { %v389_v26 = vmul.f32 %v1057_v23, %v369_v25  ;;  %v385_v27 = vmul.f32 %v1057_v23, %v365_v24 }
  0x95   : > { %v341_v28 = vpop.f32.mrf.mxu2  ;;  %v414_v30 = vsel %vm401_vm1, %v389_v26, 0.0  ;;  %v402_v31 = vsel %vm401_vm1, %v385_v27, 0.0 }
  0x96   : > { %v353_v29 = vpop.f32.mrf.mxu3  ;;  %v342_v32 = vadd.f32 %v1050_v18, %v341_v28  ;;  %415 = vadd.xlane.f32.xlu2 %v414_v30  ;;  %v320_v34 = vpop.f32.mrf.mxu0  ;;  %403 = vadd.xlane.f32.xlu0 %v402_v31 }
  0x97   : > { %v354_v33 = vadd.f32 %v1050_v18, %v353_v29  ;;  %v332_v35 = vpop.f32.mrf.mxu1  ;;  %v321_v39 = vadd.f32 %v1050_v18, %v320_v34 }
  0x98   : > { %v333_v36 = vadd.f32 %v1050_v18, %v332_v35  ;;  %v373_v37 = vmax.f32 %v342_v32, 0.0 }
  0x99   : > { %v377_v38 = vmax.f32 %v354_v33, 0.0  ;;  %v366_v47 = vmax.f32 %v321_v39, 0.0 }
  0x9a   : > { %v393_v40 = vmul.f32 %v1057_v23, %v373_v37  ;;  %v370_v42 = vmax.f32 %v333_v36, 0.0 }
  0x9b   : > { %v397_v41 = vmul.f32 %v1057_v23, %v377_v38  ;;  %v386_v53 = vmul.f32 %v1057_v23, %v366_v47  ;;  %v1105_v38 = vstv %s450_s9 }
  0x9c   : > { %v426_v43 = vsel %vm401_vm1, %v393_v40, 0.0  ;;  %v390_v50 = vmul.f32 %v1057_v23, %v370_v42 }
  0x9d   : > { %v438_v44 = vsel %vm401_vm1, %v397_v41, 0.0  ;;  %v344_v45 = vpop.f32.mrf.mxu2  ;;  %v405_v62 = vsel %vm401_vm1, %v386_v53, 0.0 }
  0x9e   : > { %v356_v46 = vpop.f32.mrf.mxu3  ;;  %427 = vadd.xlane.f32.xlu2 %v426_v43  ;;  %v323_v48 = vpop.f32.mrf.mxu0  ;;  %439 = vadd.xlane.f32.xlu0 %v438_v44  ;;  %v345_v52 = vadd.f32 %v1050_v18, %v344_v45  ;;  %v417_v55 = vsel %vm401_vm1, %v390_v50, 0.0 }
  0x9f   : > { %v324_v49 = vadd.f32 %v1050_v18, %v323_v48  ;;  %v335_v54 = vpop.f32.mrf.mxu1  ;;  %v357_v31 = vadd.f32 %v1050_v18, %v356_v46 }
  0xa0   : > { %v374_v60 = vmax.f32 %v345_v52, 0.0  ;;  %v336_v2 = vadd.f32 %v1050_v18, %v335_v54 }
  0xa1   : > { %v367_v51 = vmax.f32 %v324_v49, 0.0  ;;  %v378_v35 = vmax.f32 %v357_v31, 0.0 }
  0xa2   : > { %v394_v4 = vmul.f32 %v1057_v23, %v374_v60  ;;  %v371_v6 = vmax.f32 %v336_v2, 0.0 }
  0xa3   : > { %v387_v56 = vmul.f32 %v1057_v23, %v367_v51  ;;  %v398_v36 = vmul.f32 %v1057_v23, %v378_v35 }
  0xa4   : > { %v429_v13 = vsel %vm401_vm1, %v394_v4, 0.0  ;;  %v391_v19 = vmul.f32 %v1057_v23, %v371_v6 }
  0xa5   : > { %v347_v57 = vpop.f32.mrf.mxu2  ;;  %v408_v58 = vsel %vm401_vm1, %v387_v56, 0.0  ;;  %v441_v37 = vsel %vm401_vm1, %v398_v36, 0.0 }
  0xa6   : > { %v359_v59 = vpop.f32.mrf.mxu3  ;;  %v348_v61 = vadd.f32 %v1050_v18, %v347_v57  ;;  %418 = vadd.xlane.f32.xlu2 %v417_v55  ;;  %409 = vadd.xlane.f32.xlu1 %v408_v58  ;;  %v326_v63 = vpop.f32.mrf.mxu0  ;;  %v420_v27 = vsel %vm401_vm1, %v391_v19, 0.0 }
  0xa7   : > { %406 = vadd.xlane.f32.xlu0 %v405_v62  ;;  %v327_v0 = vadd.f32 %v1050_v18, %v326_v63  ;;  %v338_v8 = vpop.f32.mrf.mxu1  ;;  %v360_v12 = vadd.f32 %v1050_v18, %v359_v59 }
  0xa8   : > { %v375_v1 = vmax.f32 %v348_v61, 0.0  ;;  %v339_v14 = vadd.f32 %v1050_v18, %v338_v8 }
  0xa9   : > { %v368_v5 = vmax.f32 %v327_v0, 0.0  ;;  %v379_v20 = vmax.f32 %v360_v12, 0.0 }
  0xaa   : > { %v395_v3 = vmul.f32 %v1057_v23, %v375_v1  ;;  %v372_v22 = vmax.f32 %v339_v14, 0.0 }
  0xab   : > { %v388_v15 = vmul.f32 %v1057_v23, %v368_v5  ;;  %v399_v28 = vmul.f32 %v1057_v23, %v379_v20 }
  0xac   : > { %v432_v7 = vsel %vm401_vm1, %v395_v3, 0.0  ;;  %v392_v29 = vmul.f32 %v1057_v23, %v372_v22 }
  0xad   : > { %v350_v9 = vpop.f32.mrf.mxu2  ;;  %v411_v24 = vsel %vm401_vm1, %v388_v15, 0.0  ;;  %v444_v32 = vsel %vm401_vm1, %v399_v28, 0.0 }
  0xae   : > { %v362_v10 = vpop.f32.mrf.mxu3  ;;  %v351_v11 = vadd.f32 %v1050_v18, %v350_v9  ;;  %433 = vadd.xlane.f32.xlu1 %v432_v7  ;;  %v423_v33 = vsel %vm401_vm1, %v392_v29, 0.0 }
  0xaf   : > { %430 = vadd.xlane.f32.xlu0 %v429_v13  ;;  %v363_v17 = vadd.f32 %v1050_v18, %v362_v10 }
  0xb0   : > { %v376_v16 = vmax.f32 %v351_v11, 0.0 }
  0xb1   : > { %v380_v26 = vmax.f32 %v363_v17, 0.0 }
  0xb2   : > { %v396_v21 = vmul.f32 %v1057_v23, %v376_v16 }
  0xb3   : > { %v400_v30 = vmul.f32 %v1057_v23, %v380_v26 }
  0xb4   : > { %v435_v25 = vsel %vm401_vm1, %v396_v21, 0.0 }
  0xb5   : > { %436 = vadd.xlane.f32.xlu2 %v435_v25  ;;  %v447_v34 = vsel %vm401_vm1, %v400_v30, 0.0 }
  0xb6   : > { %412 = vadd.xlane.f32.xlu1 %v411_v24 }
  0xb7   : > { %421 = vadd.xlane.f32.xlu0 %v420_v27 }
  0xbd   : > { %445 = vadd.xlane.f32.xlu2 %v444_v32 }
  0xbe   : > { %424 = vadd.xlane.f32.xlu1 %v423_v33 }
  0xbf   : > { %448 = vadd.xlane.f32.xlu0 %v447_v34 }
  0xc6   : > { %442 = vadd.xlane.f32.xlu1 %v441_v37 }
 0x109   : > { %v416_v39 = vpop.xlane.xlu2 %415  ;;  %v404_v18 = vpop.xlane.xlu0 %403 }
 0x10a   : > { %v456_v40 = vadd.f32 %v1105_v38, %v416_v39  ;;  %v452_v41 = vadd.f32 %v1105_v38, %v404_v18 }
 0x10c   : > { %v874_v42 = vmul.f32 -1.442695, %v456_v40  ;;  %v870_v43 = vmul.f32 -1.442695, %v452_v41 }
 0x10e   : > { %904 = vpow2.f32 %v874_v42 }
 0x10f   : > { %906 = vpow2.f32 %v870_v43 }
 0x111   : > { %v428_v44 = vpop.xlane.xlu2 %427  ;;  %v440_v45 = vpop.xlane.xlu0 %439 }
 0x112   : > { %v460_v23 = vadd.f32 %v1105_v38, %v428_v44  ;;  %v464_v46 = vadd.f32 %v1105_v38, %v440_v45 }
 0x114   : > { %v905_v47 = vpop.eup %904  ;;  %v878_v48 = vmul.f32 -1.442695, %v460_v23  ;;  %v882_v51 = vmul.f32 -1.442695, %v464_v46 }
 0x115   : > { %v907_v49 = vpop.eup %906  ;;  %v520_v50 = vadd.f32 1.0, %v905_v47 }
 0x116   : > { %v516_v52 = vadd.f32 1.0, %v907_v49  ;;  %908 = vpow2.f32 %v878_v48 }
 0x117   : > { %910 = vrcp.f32 %v520_v50  ;;  %vm597_vm2 = vweird.f32 %v520_v50  ;;  %v601_v3 = vand.u32 2147483647, %v520_v50  ;;  %v603_v4 = vand.u32 2147483648, %v520_v50 }
 0x118   : > { %912 = vrcp.f32 %v516_v52  ;;  %v541_v10 = vand.u32 2147483647, %v516_v52  ;;  %v543_v11 = vand.u32 2147483648, %v516_v52  ;;  %vm537_vm5 = vweird.f32 %v516_v52 }
 0x119   : > { %914 = vpow2.f32 %v882_v51  ;;  %v419_v53 = vpop.xlane.xlu2 %418  ;;  %v410_v54 = vpop.xlane.xlu1 %409  ;;  %vm1125_vm7 = vcmp.eq.f32.partialorder %v601_v3, 8.507059e+37  ;;  %v604_v16 = vor.u32 1.1754944e-38, %v603_v4 }
 0x11a   : > { %v457_v55 = vadd.f32 %v1105_v38, %v419_v53  ;;  %v454_v56 = vadd.f32 %v1105_v38, %v410_v54  ;;  %v407_v57 = vpop.xlane.xlu0 %406  ;;  %vm1131_vm9 = vcmp.eq.f32.partialorder %v541_v10, 8.507059e+37  ;;  %v544_v28 = vor.u32 1.1754944e-38, %v543_v11 }
 0x11b   : > { %v453_v60 = vadd.f32 %v1105_v38, %v407_v57 }
 0x11c   : > { %v909_v58 = vpop.eup %908  ;;  %v875_v59 = vmul.f32 -1.442695, %v457_v55  ;;  %v872_v63 = vmul.f32 -1.442695, %v454_v56 }
 0x11d   : > { %v911_v61 = vpop.eup %910  ;;  %v1114_v62 = vadd.f32 1.0, %v909_v58  ;;  %v871_v8 = vmul.f32 -1.442695, %v453_v60 }
 0x11e   : > { %v913_v0 = vpop.eup %912  ;;  %v593_v1 = vmul.f32 %v911_v61, %v520_v50  ;;  %916 = vpow2.f32 %v875_v59  ;;  %vm598_vm3 = vweird.f32 %v911_v61 }
 0x11f   : > { %v915_v2 = vpop.eup %914  ;;  %v533_v5 = vmul.f32 %v913_v0, %v516_v52  ;;  %918 = vrcp.f32 %v1114_v62  ;;  %vm1121_vm6 = vmor %vm597_vm2, %vm598_vm3  ;;  %vm538_vm8 = vweird.f32 %v913_v0  ;;  %v661_v22 = vand.u32 2147483647, %v1114_v62 }
 0x120   : > { %v594_v6 = vsub.f32 1.0, %v593_v1  ;;  %v1117_v7 = vadd.f32 1.0, %v915_v2  ;;  %920 = vpow2.f32 %v872_v63  ;;  %vm539_vm10 = vmor %vm537_vm5, %vm538_vm8  ;;  %v663_v37 = vand.u32 2147483648, %v1114_v62 }
 0x121   : > { %v534_v9 = vsub.f32 1.0, %v533_v5  ;;  %v434_v12 = vpop.xlane.xlu1 %433  ;;  %vm657_vm11 = vweird.f32 %v1114_v62  ;;  %vm1158_vm12 = vcmp.eq.f32.partialorder %v661_v22, 8.507059e+37 }
 0x122   : > { %v595_v13 = vmul.f32 %v911_v61, %v594_v6  ;;  %922 = vrcp.f32 %v1117_v7  ;;  %v431_v19 = vpop.xlane.xlu0 %430  ;;  %v462_v24 = vadd.f32 %v1105_v38, %v434_v12  ;;  %v721_v44 = vand.u32 2147483647, %v1117_v7 }
 0x123   : > { %v535_v17 = vmul.f32 %v913_v0, %v534_v9  ;;  %924 = vpow2.f32 %v871_v8  ;;  %v461_v33 = vadd.f32 %v1105_v38, %v431_v19  ;;  %v723_v47 = vand.u32 2147483648, %v1117_v7 }
 0x124   : > { %v917_v20 = vpop.eup %916  ;;  %v596_v21 = vadd.f32 %v911_v61, %v595_v13  ;;  %v880_v32 = vmul.f32 -1.442695, %v462_v24  ;;  %v664_v50 = vor.u32 1.1754944e-38, %v663_v37  ;;  %vm717_vm14 = vweird.f32 %v1117_v7 }
 0x125   : > { %v919_v25 = vpop.eup %918  ;;  %v536_v26 = vadd.f32 %v913_v0, %v535_v17  ;;  %v1135_v29 = vadd.f32 1.0, %v917_v20  ;;  %v879_v48 = vmul.f32 -1.442695, %v461_v33  ;;  %vm1178_vm1 = vcmp.eq.f32.partialorder %v721_v44, 8.507059e+37 }
 0x126   : > { %v600_v30 = vsel %vm1121_vm6, %v911_v61, %v596_v21  ;;  %v653_v31 = vmul.f32 %v919_v25, %v1114_v62  ;;  %v921_v34 = vpop.eup %920  ;;  %vm658_vm13 = vweird.f32 %v919_v25  ;;  %v724_v61 = vor.u32 1.1754944e-38, %v723_v47 }
 0x127   : > { %v605_v35 = vsel %vm1125_vm7, %v604_v16, %v600_v30  ;;  %v540_v36 = vsel %vm539_vm10, %v913_v0, %v536_v26  ;;  %926 = vrcp.f32 %v1135_v29  ;;  %v1166_v45 = vadd.f32 1.0, %v921_v34  ;;  %vm659_vm15 = vmor %vm657_vm11, %vm658_vm13 }
 0x128   : > { %v923_v39 = vpop.eup %922  ;;  %777 = vst.msk [vmem:[%s1142_s12 + $0x20] sm:$0xff] %vm772_vm4, %v605_v35  ;;  %v545_v18 = vsel %vm1131_vm9, %v544_v28, %v540_v36  ;;  %v654_v40 = vsub.f32 1.0, %v653_v31  ;;  %v437_v42 = vpop.xlane.xlu2 %436  ;;  %928 = vpow2.f32 %v880_v32  ;;  %v616_v53 = vand.u32 2147483647, %v1135_v29 }
 0x129   : > { %773 = vst.msk [vmem:[%s1142_s12] sm:$0xff] %vm772_vm4, %v545_v18  ;;  %v713_v43 = vmul.f32 %v923_v39, %v1117_v7  ;;  %v925_v23 = vpop.eup %924  ;;  %v413_v49 = vpop.xlane.xlu1 %412  ;;  %930 = vrcp.f32 %v1166_v45  ;;  %vm718_vm0 = vweird.f32 %v923_v39  ;;  %v618_v57 = vand.u32 2147483648, %v1135_v29 }
 0x12a   : > { %v655_v46 = vmul.f32 %v919_v25, %v654_v40  ;;  %v1172_v54 = vadd.f32 1.0, %v925_v23  ;;  %932 = vpow2.f32 %v879_v48  ;;  %v463_v58 = vadd.f32 %v1105_v38, %v437_v42  ;;  %vm719_vm3 = vmor %vm717_vm14, %vm718_vm0  ;;  %v422_v6 = vpop.xlane.xlu0 %421 }
 0x12b   : > { %v714_v51 = vsub.f32 1.0, %v713_v43  ;;  %vm612_vm2 = vweird.f32 %v1135_v29  ;;  %vm1191_vm5 = vcmp.eq.f32.partialorder %v616_v53, 8.507059e+37  ;;  %v571_v4 = vand.u32 2147483647, %v1166_v45 }
 0x12c   : > { %v656_v52 = vadd.f32 %v919_v25, %v655_v46  ;;  %934 = vrcp.f32 %v1172_v54  ;;  %v619_v10 = vor.u32 1.1754944e-38, %v618_v57  ;;  %v881_v11 = vmul.f32 -1.442695, %v463_v58 }
 0x12d   : > { %v927_v55 = vpop.eup %926  ;;  %v715_v56 = vmul.f32 %v923_v39, %v714_v51  ;;  %v455_v12 = vadd.f32 %v1105_v38, %v413_v49  ;;  %vm567_vm7 = vweird.f32 %v1166_v45  ;;  %v573_v17 = vand.u32 2147483648, %v1166_v45 }
 0x12e   : > { %v660_v59 = vsel %vm659_vm15, %v919_v25, %v656_v52  ;;  %v608_v63 = vmul.f32 %v927_v55, %v1135_v29  ;;  %v929_v0 = vpop.eup %928  ;;  %vm613_vm6 = vweird.f32 %v927_v55  ;;  %v458_v19 = vadd.f32 %v1105_v38, %v422_v6 }
 0x12f   : > { %v665_v1 = vsel %vm1158_vm12, %v664_v50, %v660_v59  ;;  %v716_v62 = vadd.f32 %v923_v39, %v715_v56  ;;  %v1196_v5 = vadd.f32 1.0, %v929_v0  ;;  %v931_v8 = vpop.eup %930  ;;  %vm1208_vm8 = vcmp.eq.f32.partialorder %v571_v4, 8.507059e+37  ;;  %vm614_vm9 = vmor %vm612_vm2, %vm613_vm6 }
 0x130   : > { %781 = vst.msk [vmem:[%s1142_s12 + $0x40] sm:$0xff] %vm772_vm4, %v665_v1  ;;  %v609_v2 = vsub.f32 1.0, %v608_v63  ;;  %v933_v13 = vpop.eup %932  ;;  %v563_v15 = vmul.f32 %v931_v8, %v1166_v45  ;;  %v446_v16 = vpop.xlane.xlu2 %445  ;;  %v556_v24 = vand.u32 2147483647, %v1172_v54  ;;  %v873_v28 = vmul.f32 -1.442695, %v455_v12 }
 0x131   : > { %v720_v9 = vsel %vm719_vm3, %v923_v39, %v716_v62  ;;  %936 = vrcp.f32 %v1196_v5  ;;  %v425_v25 = vpop.xlane.xlu1 %424  ;;  %v1215_v27 = vadd.f32 1.0, %v933_v13  ;;  %v466_v30 = vadd.f32 %v1105_v38, %v446_v16 }
 0x132   : > { %v725_v7 = vsel %vm1178_vm1, %v724_v61, %v720_v9  ;;  %v610_v14 = vmul.f32 %v927_v55, %v609_v2  ;;  %v564_v21 = vsub.f32 1.0, %v563_v15  ;;  %v935_v26 = vpop.eup %934  ;;  %938 = vpow2.f32 %v881_v11  ;;  %v449_v46 = vpop.xlane.xlu0 %448 }
 0x133   : > { %785 = vst.msk [vmem:[%s1142_s12 + $0x60] sm:$0xff] %vm772_vm4, %v725_v7  ;;  %vm568_vm10 = vweird.f32 %v931_v8  ;;  %v548_v33 = vmul.f32 %v935_v26, %v1172_v54  ;;  %v574_v35 = vor.u32 1.1754944e-38, %v573_v17  ;;  %940 = vrcp.f32 %v1215_v27 }
 0x134   : > { %v611_v20 = vadd.f32 %v927_v55, %v610_v14  ;;  %v565_v32 = vmul.f32 %v931_v8, %v564_v21  ;;  %v876_v36 = vmul.f32 -1.442695, %v458_v19  ;;  %vm552_vm11 = vweird.f32 %v1172_v54  ;;  %vm569_vm12 = vmor %vm567_vm7, %vm568_vm10 }
 0x135   : > { %v549_v37 = vsub.f32 1.0, %v548_v33  ;;  %v558_v39 = vand.u32 2147483648, %v1172_v54  ;;  %vm1228_vm13 = vcmp.eq.f32.partialorder %v556_v24, 8.507059e+37  ;;  %942 = vpow2.f32 %v873_v28 }
 0x136   : > { %v615_v31 = vsel %vm614_vm9, %v927_v55, %v611_v20  ;;  %v566_v29 = vadd.f32 %v931_v8, %v565_v32  ;;  %v884_v41 = vmul.f32 -1.442695, %v466_v30  ;;  %v459_v42 = vadd.f32 %v1105_v38, %v425_v25 }
 0x137   : > { %v620_v34 = vsel %vm1191_vm5, %v619_v10, %v615_v31  ;;  %v937_v18 = vpop.eup %936  ;;  %v550_v44 = vmul.f32 %v935_v26, %v549_v37  ;;  %vm553_vm14 = vweird.f32 %v935_v26  ;;  %v691_v48 = vand.u32 2147483647, %v1196_v5 }
 0x138   : > { %778 = vst.msk [vmem:[%s1142_s12 + $0x28] sm:$0xff] %vm772_vm4, %v620_v34  ;;  %v570_v43 = vsel %vm569_vm12, %v931_v8, %v566_v29  ;;  %v683_v23 = vmul.f32 %v937_v18, %v1196_v5  ;;  %v939_v47 = vpop.eup %938  ;;  %v693_v49 = vand.u32 2147483648, %v1196_v5  ;;  %944 = vpow2.f32 %v876_v36  ;;  %vm554_vm15 = vmor %vm552_vm11, %vm553_vm14 }
 0x139   : > { %v575_v45 = vsel %vm1208_vm8, %v574_v35, %v570_v43  ;;  %v551_v50 = vadd.f32 %v935_v26, %v550_v44  ;;  %v1240_v52 = vadd.f32 1.0, %v939_v47  ;;  %946 = vpow2.f32 %v884_v41  ;;  %v941_v53 = vpop.eup %940  ;;  %v443_v61 = vpop.xlane.xlu1 %442 }
 0x13a   : > { %775 = vst.msk [vmem:[%s1142_s12 + $0x10] sm:$0xff] %vm772_vm4, %v575_v45  ;;  %v684_v51 = vsub.f32 1.0, %v683_v23  ;;  %v559_v55 = vor.u32 1.1754944e-38, %v558_v39  ;;  %vm687_vm0 = vweird.f32 %v1196_v5  ;;  %v877_v56 = vmul.f32 -1.442695, %v459_v42 }
 0x13b   : > { %v467_v57 = vadd.f32 %v1105_v38, %v449_v46  ;;  %v555_v58 = vsel %vm554_vm15, %v935_v26, %v551_v50  ;;  %vm688_vm1 = vweird.f32 %v937_v18  ;;  %v668_v60 = vmul.f32 %v941_v53, %v1215_v27  ;;  %v943_v63 = vpop.eup %942 }
 0x13c   : > { %v685_v59 = vmul.f32 %v937_v18, %v684_v51  ;;  %v560_v0 = vsel %vm1228_vm13, %v559_v55, %v555_v58  ;;  %vm1249_vm2 = vcmp.eq.f32.partialorder %v691_v48, 8.507059e+37  ;;  %v694_v1 = vor.u32 1.1754944e-38, %v693_v49  ;;  %vm689_vm3 = vmor %vm687_vm0, %vm688_vm1 }
 0x13d   : > { %948 = vrcp.f32 %v1240_v52  ;;  %774 = vst.msk [vmem:[%s1142_s12 + $0x8] sm:$0xff] %vm772_vm4, %v560_v0  ;;  %v669_v2 = vsub.f32 1.0, %v668_v60  ;;  %v676_v3 = vand.u32 2147483647, %v1215_v27  ;;  %v1257_v4 = vadd.f32 1.0, %v943_v63 }
 0x13e   : > { %v686_v62 = vadd.f32 %v937_v18, %v685_v59  ;;  %v945_v6 = vpop.eup %944  ;;  %v678_v8 = vand.u32 2147483648, %v1215_v27  ;;  %950 = vpow2.f32 %v877_v56  ;;  %v885_v9 = vmul.f32 -1.442695, %v467_v57 }
 0x13f   : > { %v465_v10 = vadd.f32 %v1105_v38, %v443_v61  ;;  %v947_v11 = vpop.eup %946  ;;  %v670_v13 = vmul.f32 %v941_v53, %v669_v2  ;;  %vm673_vm5 = vweird.f32 %v941_v53  ;;  %952 = vrcp.f32 %v1257_v4 }
 0x140   : > { %v690_v12 = vsel %vm689_vm3, %v937_v18, %v686_v62  ;;  %vm672_vm6 = vweird.f32 %v1215_v27  ;;  %v1269_v14 = vadd.f32 1.0, %v945_v6  ;;  %v1271_v15 = vadd.f32 1.0, %v947_v11 }
 0x141   : > { %v695_v7 = vsel %vm1249_vm2, %v694_v1, %v690_v12  ;;  %v671_v5 = vadd.f32 %v941_v53, %v670_v13  ;;  %954 = vpow2.f32 %v885_v9  ;;  %vm674_vm7 = vmor %vm672_vm6, %vm673_vm5  ;;  %v679_v16 = vor.u32 1.1754944e-38, %v678_v8 }
 0x142   : > { %783 = vst.msk [vmem:[%s1142_s12 + $0x50] sm:$0xff] %vm772_vm4, %v695_v7  ;;  %v883_v17 = vmul.f32 -1.442695, %v465_v10  ;;  %vm677_vm8 = vcmp.eq.f32.partialorder %v676_v3, 8.507059e+37  ;;  %956 = vrcp.f32 %v1269_v14  ;;  %v706_v26 = vand.u32 2147483647, %v1240_v52 }
 0x143   : > { %v949_v38 = vpop.eup %948  ;;  %v675_v19 = vsel %vm674_vm7, %v941_v53, %v671_v5  ;;  %v708_v27 = vand.u32 2147483648, %v1240_v52  ;;  %958 = vrcp.f32 %v1271_v15  ;;  %vm702_vm9 = vweird.f32 %v1240_v52 }
 0x144   : > { %v698_v20 = vmul.f32 %v949_v38, %v1240_v52  ;;  %v951_v21 = vpop.eup %950  ;;  %v680_v22 = vsel %vm677_vm8, %v679_v16, %v675_v19  ;;  %v586_v30 = vand.u32 2147483647, %v1257_v4  ;;  %960 = vpow2.f32 %v883_v17 }
 0x145   : > { %v953_v24 = vpop.eup %952  ;;  %782 = vst.msk [vmem:[%s1142_s12 + $0x48] sm:$0xff] %vm772_vm4, %v680_v22  ;;  %vm703_vm10 = vweird.f32 %v949_v38  ;;  %v588_v33 = vand.u32 2147483648, %v1257_v4  ;;  %v1284_v34 = vadd.f32 1.0, %v951_v21  ;;  %vm707_vm11 = vcmp.eq.f32.partialorder %v706_v26, 8.507059e+37 }
 0x146   : > { %v699_v25 = vsub.f32 1.0, %v698_v20  ;;  %v578_v28 = vmul.f32 %v953_v24, %v1257_v4  ;;  %v709_v39 = vor.u32 1.1754944e-38, %v708_v27  ;;  %vm704_vm12 = vmor %vm702_vm9, %vm703_vm10  ;;  %vm582_vm13 = vweird.f32 %v1257_v4 }
 0x147   : > { %v955_v31 = vpop.eup %954  ;;  %962 = vrcp.f32 %v1284_v34  ;;  %vm583_vm14 = vweird.f32 %v953_v24  ;;  %vm1293_vm15 = vcmp.eq.f32.partialorder %v586_v30, 8.507059e+37  ;;  %v589_v44 = vor.u32 1.1754944e-38, %v588_v33 }
 0x148   : > { %v700_v32 = vmul.f32 %v949_v38, %v699_v25  ;;  %v579_v35 = vsub.f32 1.0, %v578_v28  ;;  %v1286_v36 = vadd.f32 1.0, %v955_v31  ;;  %v957_v29 = vpop.eup %956  ;;  %vm584_vm0 = vmor %vm582_vm13, %vm583_vm14  ;;  %vm627_vm1 = vweird.f32 %v1269_v14 }
 0x149   : > { %v623_v40 = vmul.f32 %v957_v29, %v1269_v14  ;;  %v959_v41 = vpop.eup %958  ;;  %v631_v49 = vand.u32 2147483647, %v1269_v14  ;;  %v633_v50 = vand.u32 2147483648, %v1269_v14  ;;  %v751_v51 = vand.u32 2147483647, %v1271_v15 }
 0x14a   : > { %v701_v37 = vadd.f32 %v949_v38, %v700_v32  ;;  %v580_v18 = vmul.f32 %v953_v24, %v579_v35  ;;  %964 = vrcp.f32 %v1286_v36  ;;  %v961_v23 = vpop.eup %960  ;;  %v743_v48 = vmul.f32 %v959_v41, %v1271_v15 }
 0x14b   : > { %v624_v45 = vsub.f32 1.0, %v623_v40  ;;  %vm628_vm2 = vweird.f32 %v957_v29  ;;  %vm747_vm3 = vweird.f32 %v1271_v15  ;;  %v753_v58 = vand.u32 2147483648, %v1271_v15 }
 0x14c   : > { %v705_v42 = vsel %vm704_vm12, %v949_v38, %v701_v37  ;;  %v581_v47 = vadd.f32 %v953_v24, %v580_v18  ;;  %v744_v55 = vsub.f32 1.0, %v743_v48  ;;  %v529_v59 = vadd.f32 1.0, %v961_v23  ;;  %vm629_vm6 = vmor %vm627_vm1, %vm628_vm2 }
 0x14d   : > { %v710_v46 = vsel %vm707_vm11, %v709_v39, %v705_v42  ;;  %v625_v53 = vmul.f32 %v957_v29, %v624_v45  ;;  %v963_v56 = vpop.eup %962  ;;  %vm748_vm5 = vweird.f32 %v959_v41  ;;  %vm632_vm7 = vcmp.eq.f32.partialorder %v631_v49, 8.507059e+37 }
 0x14e   : > { %784 = vst.msk [vmem:[%s1142_s12 + $0x58] sm:$0xff] %vm772_vm4, %v710_v46  ;;  %v585_v52 = vsel %vm584_vm0, %v953_v24, %v581_v47  ;;  %v745_v61 = vmul.f32 %v959_v41, %v744_v55  ;;  %v638_v63 = vmul.f32 %v963_v56, %v1284_v34  ;;  %v634_v54 = vor.u32 1.1754944e-38, %v633_v50  ;;  %vm749_vm9 = vmor %vm747_vm3, %vm748_vm5 }
 0x14f   : > { %v590_v57 = vsel %vm1293_vm15, %v589_v44, %v585_v52  ;;  %v626_v60 = vadd.f32 %v957_v29, %v625_v53  ;;  %vm1314_vm8 = vcmp.eq.f32.partialorder %v751_v51, 8.507059e+37  ;;  %966 = vrcp.f32 %v529_v59 }
 0x150   : > { %776 = vst.msk [vmem:[%s1142_s12 + $0x18] sm:$0xff] %vm772_vm4, %v590_v57  ;;  %v965_v0 = vpop.eup %964  ;;  %v746_v2 = vadd.f32 %v959_v41, %v745_v61  ;;  %v639_v3 = vsub.f32 1.0, %v638_v63  ;;  %v754_v8 = vor.u32 1.1754944e-38, %v753_v58  ;;  %v646_v9 = vand.u32 2147483647, %v1284_v34 }
 0x151   : > { %v630_v62 = vsel %vm629_vm6, %v957_v29, %v626_v60  ;;  %v758_v4 = vmul.f32 %v965_v0, %v1286_v36  ;;  %v648_v10 = vand.u32 2147483648, %v1284_v34  ;;  %vm643_vm10 = vweird.f32 %v963_v56 }
 0x152   : > { %v635_v6 = vsel %vm632_vm7, %v634_v54, %v630_v62  ;;  %v750_v11 = vsel %vm749_vm9, %v959_v41, %v746_v2  ;;  %v640_v12 = vmul.f32 %v963_v56, %v639_v3  ;;  %vm642_vm11 = vweird.f32 %v1284_v34 }
 0x153   : > { %779 = vst.msk [vmem:[%s1142_s12 + $0x30] sm:$0xff] %vm772_vm4, %v635_v6  ;;  %v759_v13 = vsub.f32 1.0, %v758_v4  ;;  %v755_v7 = vsel %vm1314_vm8, %v754_v8, %v750_v11  ;;  %vm762_vm12 = vweird.f32 %v1286_v36  ;;  %v768_v5 = vand.u32 2147483648, %v1286_v36  ;;  %vm644_vm14 = vmor %vm642_vm11, %vm643_vm10 }
 0x154   : > { %787 = vst.msk [vmem:[%s1142_s12 + $0x70] sm:$0xff] %vm772_vm4, %v755_v7  ;;  %v641_v14 = vadd.f32 %v963_v56, %v640_v12  ;;  %vm763_vm13 = vweird.f32 %v965_v0  ;;  %v766_v38 = vand.u32 2147483647, %v1286_v36  ;;  %v649_v17 = vor.u32 1.1754944e-38, %v648_v10 }
 0x155   : > { %v760_v15 = vmul.f32 %v965_v0, %v759_v13  ;;  %v967_v16 = vpop.eup %966  ;;  %vm647_vm15 = vcmp.eq.f32.partialorder %v646_v9, 8.507059e+37  ;;  %vm764_vm0 = vmor %vm762_vm12, %vm763_vm13  ;;  %v769_v24 = vor.u32 1.1754944e-38, %v768_v5  ;;  %v738_v28 = vand.u32 2147483648, %v529_v59 }
 0x156   : > { %v645_v19 = vsel %vm644_vm14, %v963_v56, %v641_v14  ;;  %v728_v21 = vmul.f32 %v967_v16, %v529_v59  ;;  %vm767_vm1 = vcmp.eq.f32.partialorder %v766_v38, 8.507059e+37  ;;  %vm733_vm2 = vweird.f32 %v967_v16 }
 0x157   : > { %v761_v20 = vadd.f32 %v965_v0, %v760_v15  ;;  %v650_v22 = vsel %vm647_vm15, %v649_v17, %v645_v19  ;;  %v736_v31 = vand.u32 2147483647, %v529_v59  ;;  %vm732_vm3 = vweird.f32 %v529_v59 }
 0x158   : > { %780 = vst.msk [vmem:[%s1142_s12 + $0x38] sm:$0xff] %vm772_vm4, %v650_v22  ;;  %v729_v26 = vsub.f32 1.0, %v728_v21  ;;  %vm734_vm5 = vmor %vm732_vm3, %vm733_vm2  ;;  %v739_v33 = vor.u32 1.1754944e-38, %v738_v28 }
 0x159   : > { %v765_v25 = vsel %vm764_vm0, %v965_v0, %v761_v20  ;;  %vm737_vm6 = vcmp.eq.f32.partialorder %v736_v31, 8.507059e+37 }
 0x15a   : > { %v770_v27 = vsel %vm767_vm1, %v769_v24, %v765_v25  ;;  %v730_v30 = vmul.f32 %v967_v16, %v729_v26 }
 0x15b   : > { %788 = vst.msk [vmem:[%s1142_s12 + $0x78] sm:$0xff] %vm772_vm4, %v770_v27 }
 0x15c   : > { %v731_v32 = vadd.f32 %v967_v16, %v730_v30 }
 0x15e   : > { %v735_v34 = vsel %vm734_vm5, %v967_v16, %v731_v32 }
 0x15f   : > { %v740_v35 = vsel %vm737_vm6, %v739_v33, %v735_v34 }
 0x160   : > { %786 = vst.msk [vmem:[%s1142_s12 + $0x68] sm:$0xff] %vm772_vm4, %v740_v35 }
 0x161 PF: > { %s16_s20 = sadd.s32 1, %s974_s20  }
 0x162   : > { %p13_p4 = scmp.ge.s32.totalorder %s16_s20, 4  }
 0x164   :  { %15 = sbr.rel (!%p13_p4) target bundleno = 2 (0x2), region = 70 }

</bundles_post_ra>
